<compile_context>
chip_gen: v5e
topology: v5e:2x2
jax: 0.10.0
libtpu: 0.0.40
codegen_flags: <defaults>
</compile_context>

<pallas_src>
import functools

import jax
import jax.numpy as jnp
from jax import lax
from jax.experimental import pallas as pl
from jax.experimental.pallas import tpu as pltpu

N0, N1, N2, N3 = 784, 32, 10, 10
BN_EPS = 1e-5
DEFAULT_TILE_B = 1024  # batch rows per grid step (multiple of 16 for bf16 sublane packing)


def _bn_apply(h, mean, var, gamma, beta):
    """Normalize with precomputed batch statistics (training-mode BatchNorm1d)."""
    return (h - mean) * lax.rsqrt(var + BN_EPS) * gamma + beta


def _chan_accumulate(h, i, tile_rows, mean_acc, m2_acc):
    """Streaming batch stats: per-tile *centered* partials combined with Chan's
    parallel-variance update. Avoids the E[x^2] - E[x]^2 cancellation of the
    one-pass form (post-ReLU activations have large positive means)."""
    mu_t = jnp.mean(h, axis=0, keepdims=True)
    m2_t = jnp.sum(jnp.square(h - mu_t), axis=0, keepdims=True)

    @pl.when(i == 0)
    def _():
        mean_acc[...] = mu_t
        m2_acc[...] = m2_t

    @pl.when(i > 0)
    def _():
        n_a = (i * tile_rows).astype(jnp.float32)   # rows already accumulated
        n_b = float(tile_rows)                      # rows in this tile
        inv_n = 1.0 / (n_a + n_b)
        delta = mu_t - mean_acc[...]
        mean_acc[...] = mean_acc[...] + delta * (n_b * inv_n)
        m2_acc[...] = m2_acc[...] + m2_t + jnp.square(delta) * (n_a * n_b * inv_n)


def _stage1_kernel(x_ref, w1_ref, h1_ref, st1_ref, mean_acc, m2_acc, *, total_rows):
    """Stream x: h1 = x @ W1 (bf16 in, f32 acc), write h1, accumulate BN1 stats."""
    i = pl.program_id(0)
    tile_rows = x_ref.shape[0]

    # Pre-BN bias b1 omitted on purpose: cancelled by the batch-mean subtraction.
    h1 = jnp.dot(x_ref[...], w1_ref[...], preferred_element_type=jnp.float32)
    h1_ref[...] = h1

    _chan_accumulate(h1, i, tile_rows, mean_acc, m2_acc)

    @pl.when(i == pl.num_programs(0) - 1)
    def _():
        st1_ref[0:1, :] = mean_acc[...]
        st1_ref[1:2, :] = m2_acc[...] * (1.0 / total_rows)   # biased batch variance


def _stage2_kernel(st1_ref, h1_ref, g1_ref, be1_ref, w2_ref, g2_ref, be2_ref,
                   w3_ref, b3_ref, o_ref, mean2_acc, m2_2_acc, *, total_rows):
    """Two-phase tail over h1 tiles.
    phase 0: accumulate BN2 batch statistics of h2 = relu(bn1(h1)) @ W2.
    phase 1: normalize h2, relu, final Linear(10->10)+bias, store (tile, 10) output.
    """
    ph = pl.program_id(0)
    i = pl.program_id(1)
    tile_rows = h1_ref.shape[0]

    mean1 = st1_ref[0:1, :]
    var1 = st1_ref[1:2, :]
    a1 = jnp.maximum(
        _bn_apply(h1_ref[...], mean1, var1, g1_ref[...], be1_ref[...]), 0.0)
    # Pre-BN bias b2 omitted (cancelled by training-mode BN), f32 throughout.
    h2 = jnp.dot(a1, w2_ref[...], preferred_element_type=jnp.float32)

    @pl.when(ph == 0)
    def _():
        _chan_accumulate(h2, i, tile_rows, mean2_acc, m2_2_acc)

    @pl.when(ph == 1)
    def _():
        var2 = m2_2_acc[...] * (1.0 / total_rows)
        a2 = jnp.maximum(
            _bn_apply(h2, mean2_acc[...], var2, g2_ref[...], be2_ref[...]), 0.0)
        out = jnp.dot(a2, w3_ref[...], preferred_element_type=jnp.float32) + b3_ref[...]
        o_ref[...] = out.astype(o_ref.dtype)


def mynet_forward(x, params, *, tile_b=DEFAULT_TILE_B):
    """Forward pass of MyNet with training-mode BatchNorm statistics."""
    w1, b1, g1, be1, w2, b2, g2, be2, w3, b3 = params
    del b1, b2  # no-ops before training-mode BN (cancelled by mean subtraction)

    B = x.shape[0]
    tb = min(tile_b, B)
    if B % tb != 0 or tb % 16 != 0:
        # Zero-padding the batch would corrupt the BN statistics, so fall back to
        # a single full-batch tile for odd / tiny batch sizes instead of padding.
        tb = B
    nt = B // tb

    # bf16 stream for the dominant bytes (x and W1); MXU accumulates in f32 and
    # all BN / ReLU math stays f32.
    x_bf = x.astype(jnp.bfloat16)
    w1_bf = w1.astype(jnp.bfloat16)

    # ---- Stage 1: stream x -> h1 (B, 32) f32 + BN1 stats (2, 32) -------------
    h1, stats1 = pl.pallas_call(
        functools.partial(_stage1_kernel, total_rows=float(B)),
        grid=(nt,),
        in_specs=[
            pl.BlockSpec((tb, N0), lambda i: (i, 0)),      # x: streamed batch tiles
            pl.BlockSpec((N0, N1), lambda i: (0, 0)),      # W1: resident, DMA'd once
        ],
        out_specs=(
            pl.BlockSpec((tb, N1), lambda i: (i, 0)),      # h1: written per tile
            pl.BlockSpec((2, N1), lambda i: (0, 0)),       # stats: resident accumulator
        ),
        out_shape=(
            jax.ShapeDtypeStruct((B, N1), jnp.float32),
            jax.ShapeDtypeStruct((2, N1), jnp.float32),
        ),
        scratch_shapes=[
            pltpu.VMEM((1, N1), jnp.float32),              # running mean
            pltpu.VMEM((1, N1), jnp.float32),              # running centered M2
        ],
        compiler_params=pltpu.CompilerParams(
            dimension_semantics=("arbitrary",)),           # stats carried across batch axis
    )(x_bf, w1_bf)

    # ---- Stage 2: two-phase (stats, normalize) over h1 tiles -> out (B, 10) --
    out = pl.pallas_call(
        functools.partial(_stage2_kernel, total_rows=float(B)),
        grid=(2, nt),                                      # (phase, batch tile)
        in_specs=[
            pl.BlockSpec((2, N1), lambda p, i: (0, 0)),    # BN1 stats (resident)
            pl.BlockSpec((tb, N1), lambda p, i: (i, 0)),   # h1 tiles (read each phase)
            pl.BlockSpec((1, N1), lambda p, i: (0, 0)),    # gamma1
            pl.BlockSpec((1, N1), lambda p, i: (0, 0)),    # beta1
            pl.BlockSpec((N1, N2), lambda p, i: (0, 0)),   # W2
            pl.BlockSpec((1, N2), lambda p, i: (0, 0)),    # gamma2
            pl.BlockSpec((1, N2), lambda p, i: (0, 0)),    # beta2
            pl.BlockSpec((N2, N3), lambda p, i: (0, 0)),   # W3
            pl.BlockSpec((1, N3), lambda p, i: (0, 0)),    # b3
        ],
        # p*i keeps phase 0 on a resident (never written-back) block; phase 1
        # writes the exact (tb, 10) f32 tiles -> minimal HBM write traffic.
        out_specs=pl.BlockSpec((tb, N3), lambda p, i: (p * i, 0)),
        out_shape=jax.ShapeDtypeStruct((B, N3), jnp.float32),
        scratch_shapes=[
            pltpu.VMEM((1, N2), jnp.float32),              # running mean (BN2)
            pltpu.VMEM((1, N2), jnp.float32),              # running centered M2 (BN2)
        ],
        compiler_params=pltpu.CompilerParams(
            dimension_semantics=("arbitrary", "arbitrary")),
    )(stats1, h1, g1, be1, w2, g2, be2, w3, b3)

    return out


def init_params(key):
    # Deterministic synthetic init (PyTorch-style uniform bounds for Linear layers;
    # BatchNorm gamma=1, beta=0). Biases / gamma / beta kept 2D (1, C) for TPU layout.
    # b1/b2 are created for parameter-set fidelity with nn.Linear but are unused in
    # the forward (mathematical no-ops before training-mode BatchNorm).
    ks = jax.random.split(key, 6)

    def linear(kw, kb, fan_in, fan_out):
        bound = 1.0 / jnp.sqrt(float(fan_in))
        w = jax.random.uniform(kw, (fan_in, fan_out), jnp.float32, -bound, bound)
        b = jax.random.uniform(kb, (1, fan_out), jnp.float32, -bound, bound)
        return w, b

    w1, b1 = linear(ks[0], ks[1], N0, N1)
    w2, b2 = linear(ks[2], ks[3], N1, N2)
    w3, b3 = linear(ks[4], ks[5], N2, N3)
    g1, be1 = jnp.ones((1, N1), jnp.float32), jnp.zeros((1, N1), jnp.float32)
    g2, be2 = jnp.ones((1, N2), jnp.float32), jnp.zeros((1, N2), jnp.float32)
    return (w1, b1, g1, be1, w2, b2, g2, be2, w3, b3)


def mynet_reference(x, params):
    """Plain-JAX reference (training-mode BN, biased variance, bf16 first matmul)."""
    w1, b1, g1, be1, w2, b2, g2, be2, w3, b3 = params

    def bn(h, g, be):
        m = jnp.mean(h, axis=0, keepdims=True)
        v = jnp.var(h, axis=0, keepdims=True)
        return (h - m) * lax.rsqrt(v + BN_EPS) * g + be

    h1 = jnp.dot(x.astype(jnp.bfloat16), w1.astype(jnp.bfloat16),
                 preferred_element_type=jnp.float32) + b1
    a1 = jnp.maximum(bn(h1, g1, be1), 0.0)
    h2 = jnp.dot(a1, w2, preferred_element_type=jnp.float32) + b2
    a2 = jnp.maximum(bn(h2, g2, be2), 0.0)
    return jnp.dot(a2, w3, preferred_element_type=jnp.float32) + b3


if __name__ == "__main__":
    key = jax.random.PRNGKey(0)
    kx, kp = jax.random.split(key)

    B = 512  # >1 required for BatchNorm1d training-mode statistics
    x = jax.random.normal(kx, (B, N0), dtype=jnp.float32)
    params = init_params(kp)

    # tile_b=128 -> 4 batch tiles: exercises the streaming grid, the Chan stats
    # combination and the two-phase normalize at a small demo size.
    out = mynet_forward(x, params, tile_b=128)
    out = jax.block_until_ready(out)
    assert out.shape == (B, N3) and out.dtype == jnp.float32

    ref = mynet_reference(x, params)
    max_err = float(jnp.max(jnp.abs(out - ref)))
    assert max_err < 1e-2, f"max abs error vs reference: {max_err}"

    print("KERNEL_OK")
</pallas_src>

<mosaic_0001>
module attributes {stable_mosaic.version = 11 : i64} {
  func.func @_stage1_kernel(%arg0: i32, %arg1: memref<128x784xbf16, #tpu.memory_space<vmem>>, %arg2: memref<784x32xbf16, #tpu.memory_space<vmem>>, %arg3: memref<128x32xf32, #tpu.memory_space<vmem>>, %arg4: memref<2x32xf32, #tpu.memory_space<vmem>>, %arg5: memref<1x32xf32, #tpu.memory_space<vmem>>, %arg6: memref<1x32xf32, #tpu.memory_space<vmem>>) attributes {dimension_semantics = [#tpu.dimension_semantics<arbitrary>], iteration_bounds = array<i64: 4>, scalar_prefetch = 0 : i64, scratch_operands = 2 : i64, tpu.core_type = #tpu.core_type<tc>, window_params = [{transform_indices = @transform_0, window_bounds = array<i64: 128, 784>}, {pipeline_mode = #tpu.pipeline_mode<synchronous>, transform_indices = @transform_1, window_bounds = array<i64: 784, 32>}, {transform_indices = @transform_2, window_bounds = array<i64: 128, 32>}, {pipeline_mode = #tpu.pipeline_mode<synchronous>, transform_indices = @transform_3, window_bounds = array<i64: 2, 32>}]} {
    %c0 = arith.constant 0 : index
    %c0_0 = arith.constant 0 : index
    %0 = vector.load %arg1[%c0, %c0_0] : memref<128x784xbf16, #tpu.memory_space<vmem>>, vector<128x784xbf16>
    %c0_1 = arith.constant 0 : index
    %c0_2 = arith.constant 0 : index
    %1 = vector.load %arg2[%c0_1, %c0_2] : memref<784x32xbf16, #tpu.memory_space<vmem>>, vector<784x32xbf16>
    %cst = arith.constant dense<0.000000e+00> : vector<128x32xf32>
    %2 = tpu.matmul %0, %1, %cst {dimension_numbers = #tpu.dot_dimension_numbers<[1], [0], [0], [1], [0, 0, 1, 1], [], []>} : vector<128x784xbf16>, vector<784x32xbf16>, vector<128x32xf32> -> vector<128x32xf32>
    %c0_3 = arith.constant 0 : index
    %c0_4 = arith.constant 0 : index
    %3 = vector.load %arg3[%c0_3, %c0_4] : memref<128x32xf32, #tpu.memory_space<vmem>>, vector<128x32xf32>
    tpu.vector_store %arg3[%c0_3, %c0_4], %2 {strides = array<i32>} : memref<128x32xf32, #tpu.memory_space<vmem>>, vector<128x32xf32>,
    %cst_5 = arith.constant dense<0.000000e+00> : vector<32xf32>
    %4 = vector.multi_reduction <add>, %2, %cst_5 [0] : vector<128x32xf32> to vector<32xf32>
    %5 = vector.shape_cast %4 : vector<32xf32> to vector<1x32xf32>
    %cst_6 = arith.constant 1.280000e+02 : f32
    %6 = vector.broadcast %cst_6 : f32 to vector<1x32xf32>
    %7 = arith.divf %5, %6 : vector<1x32xf32>
    %8 = vector.broadcast %7 : vector<1x32xf32> to vector<128x32xf32>
    %9 = arith.subf %2, %8 : vector<128x32xf32>
    %10 = arith.mulf %9, %9 : vector<128x32xf32>
    %cst_7 = arith.constant dense<0.000000e+00> : vector<32xf32>
    %11 = vector.multi_reduction <add>, %10, %cst_7 [0] : vector<128x32xf32> to vector<32xf32>
    %12 = vector.shape_cast %11 : vector<32xf32> to vector<1x32xf32>
    %c0_i32 = arith.constant 0 : i32
    %13 = arith.cmpi eq, %arg0, %c0_i32 : i32
    %14 = arith.extui %13 : i1 to i32
    %c0_i32_8 = arith.constant 0 : i32
    %15 = arith.cmpi ne, %14, %c0_i32_8 : i32
    scf.if %15 {
      %c0_12 = arith.constant 0 : index
      %c0_13 = arith.constant 0 : index
      %22 = vector.load %arg5[%c0_12, %c0_13] : memref<1x32xf32, #tpu.memory_space<vmem>>, vector<1x32xf32>
      tpu.vector_store %arg5[%c0_12, %c0_13], %7 {strides = array<i32>} : memref<1x32xf32, #tpu.memory_space<vmem>>, vector<1x32xf32>,
      %c0_14 = arith.constant 0 : index
      %c0_15 = arith.constant 0 : index
      %23 = vector.load %arg6[%c0_14, %c0_15] : memref<1x32xf32, #tpu.memory_space<vmem>>, vector<1x32xf32>
      tpu.vector_store %arg6[%c0_14, %c0_15], %12 {strides = array<i32>} : memref<1x32xf32, #tpu.memory_space<vmem>>, vector<1x32xf32>,
    } else {
    }
    %c0_i32_9 = arith.constant 0 : i32
    %16 = arith.cmpi sgt, %arg0, %c0_i32_9 : i32
    %17 = arith.extui %16 : i1 to i32
    %c0_i32_10 = arith.constant 0 : i32
    %18 = arith.cmpi ne, %17, %c0_i32_10 : i32
    scf.if %18 {
      %c128_i32 = arith.constant 128 : i32
      %22 = arith.muli %arg0, %c128_i32 : i32
      %23 = arith.sitofp %22 : i32 to f32
      %cst_12 = arith.constant 1.280000e+02 : f32
      %24 = arith.addf %23, %cst_12 : f32
      %cst_13 = arith.constant 1.000000e+00 : f32
      %25 = arith.divf %cst_13, %24 : f32
      %c0_14 = arith.constant 0 : index
      %c0_15 = arith.constant 0 : index
      %26 = vector.load %arg5[%c0_14, %c0_15] : memref<1x32xf32, #tpu.memory_space<vmem>>, vector<1x32xf32>
      %27 = arith.subf %7, %26 : vector<1x32xf32>
      %c0_16 = arith.constant 0 : index
      %c0_17 = arith.constant 0 : index
      %28 = vector.load %arg5[%c0_16, %c0_17] : memref<1x32xf32, #tpu.memory_space<vmem>>, vector<1x32xf32>
      %cst_18 = arith.constant 1.280000e+02 : f32
      %29 = arith.mulf %cst_18, %25 : f32
      %30 = vector.broadcast %29 : f32 to vector<1x32xf32>
      %31 = arith.mulf %27, %30 : vector<1x32xf32>
      %32 = arith.addf %28, %31 : vector<1x32xf32>
      %c0_19 = arith.constant 0 : index
      %c0_20 = arith.constant 0 : index
      %33 = vector.load %arg5[%c0_19, %c0_20] : memref<1x32xf32, #tpu.memory_space<vmem>>, vector<1x32xf32>
      tpu.vector_store %arg5[%c0_19, %c0_20], %32 {strides = array<i32>} : memref<1x32xf32, #tpu.memory_space<vmem>>, vector<1x32xf32>,
      %c0_21 = arith.constant 0 : index
      %c0_22 = arith.constant 0 : index
      %34 = vector.load %arg6[%c0_21, %c0_22] : memref<1x32xf32, #tpu.memory_space<vmem>>, vector<1x32xf32>
      %35 = arith.addf %34, %12 : vector<1x32xf32>
      %36 = arith.mulf %27, %27 : vector<1x32xf32>
      %cst_23 = arith.constant 1.280000e+02 : f32
      %37 = arith.mulf %23, %cst_23 : f32
      %38 = arith.mulf %37, %25 : f32
      %39 = vector.broadcast %38 : f32 to vector<1x32xf32>
      %40 = arith.mulf %36, %39 : vector<1x32xf32>
      %41 = arith.addf %35, %40 : vector<1x32xf32>
      %c0_24 = arith.constant 0 : index
      %c0_25 = arith.constant 0 : index
      %42 = vector.load %arg6[%c0_24, %c0_25] : memref<1x32xf32, #tpu.memory_space<vmem>>, vector<1x32xf32>
      tpu.vector_store %arg6[%c0_24, %c0_25], %41 {strides = array<i32>} : memref<1x32xf32, #tpu.memory_space<vmem>>, vector<1x32xf32>,
    } else {
    }
    %c3_i32 = arith.constant 3 : i32
    %19 = arith.cmpi eq, %arg0, %c3_i32 : i32
    %20 = arith.extui %19 : i1 to i32
    %c0_i32_11 = arith.constant 0 : i32
    %21 = arith.cmpi ne, %20, %c0_i32_11 : i32
    scf.if %21 {
      %c0_12 = arith.constant 0 : index
      %c0_13 = arith.constant 0 : index
      %22 = vector.load %arg5[%c0_12, %c0_13] : memref<1x32xf32, #tpu.memory_space<vmem>>, vector<1x32xf32>
      %c0_14 = arith.constant 0 : index
      %c0_15 = arith.constant 0 : index
      %23 = vector.load %arg4[%c0_14, %c0_15] : memref<2x32xf32, #tpu.memory_space<vmem>>, vector<1x32xf32>
      tpu.vector_store %arg4[%c0_14, %c0_15], %22 {strides = array<i32>} : memref<2x32xf32, #tpu.memory_space<vmem>>, vector<1x32xf32>,
      %c0_16 = arith.constant 0 : index
      %c0_17 = arith.constant 0 : index
      %24 = vector.load %arg6[%c0_16, %c0_17] : memref<1x32xf32, #tpu.memory_space<vmem>>, vector<1x32xf32>
      %cst_18 = arith.constant 0.001953125 : f32
      %25 = vector.broadcast %cst_18 : f32 to vector<1x32xf32>
      %26 = arith.mulf %24, %25 : vector<1x32xf32>
      %c1 = arith.constant 1 : index
      %c0_19 = arith.constant 0 : index
      %27 = vector.load %arg4[%c1, %c0_19] : memref<2x32xf32, #tpu.memory_space<vmem>>, vector<1x32xf32>
      tpu.vector_store %arg4[%c1, %c0_19], %26 {strides = array<i32>} : memref<2x32xf32, #tpu.memory_space<vmem>>, vector<1x32xf32>,
    } else {
    }
    return
  }
  func.func @transform_0(%arg0: i32) -> (i32, i32) {
    %c0_i32 = arith.constant 0 : i32
    %c0_i32_0 = arith.constant 0 : i32
    return %arg0, %c0_i32 : i32, i32
  }
  func.func @transform_1(%arg0: i32) -> (i32, i32) {
    %c0_i32 = arith.constant 0 : i32
    %c0_i32_0 = arith.constant 0 : i32
    %c0_i32_1 = arith.constant 0 : i32
    return %c0_i32, %c0_i32_0 : i32, i32
  }
  func.func @transform_2(%arg0: i32) -> (i32, i32) {
    %c0_i32 = arith.constant 0 : i32
    %c0_i32_0 = arith.constant 0 : i32
    return %arg0, %c0_i32 : i32, i32
  }
  func.func @transform_3(%arg0: i32) -> (i32, i32) {
    %c0_i32 = arith.constant 0 : i32
    %c0_i32_0 = arith.constant 0 : i32
    %c0_i32_1 = arith.constant 0 : i32
    return %c0_i32, %c0_i32_0 : i32, i32
  }
}

</mosaic_0001>

<bundles_post_ra>
// kernel: tpu_custom_call.1
= control target key start
LH: loop header
LB: loop body
LE: loop exit
PB: predicated region body
PF: predicated region fallthrough
CT: control target
= control target key end

     0   :  { %9 = vsyncpa [#allocation5], 0  ;;  %s2210_s12 = smov 0   ;;  %s2781_s0 = inlined_call_operand.vmem [shape: bf16[512,784], index: 0, kind: input, shape index: {}]   ;;  %s2782_s1 = inlined_call_operand.vmem [shape: bf16[784,32], index: 1, kind: input, shape index: {}]   ;;  %s2783_s2 = inlined_call_operand.vmem [shape: f32[512,32], index: 2, kind: output, shape index: {0}]   ;;  %s2784_s3 = inlined_call_operand.hbm [shape: f32[2,32], index: 3, kind: output, shape index: {1}]  }
   0x1 LB: > { %s2216_s13 = sadd.s32 4294967295, %s2186_s12   ;;  %p1555_p0 = scmp.ge.s32.totalorder %s2186_s12, 1  ;;  %s2186_s12 = sphi %s2210_s12, %s15_s12  }
   0x2   : > { %p138_p1 = scmp.lt.s32.totalorder %s2186_s12, 5 }
   0x4   : > { %p139_p2 = pnand %p1555_p0, %p138_p1 }
   0x5   : > { %s1556_s5 = sshll.u32 (!%p139_p2), %s2216_s13, 4  ;;  %p1988_p4 = scmp.ne.s32.totalorder (!%p139_p2), %s2216_s13, 0 }
   0x6   : > { %142 = sbr.rel (%p139_p2) target bundleno = 565 (0x235), region = 28  ;;  %p164_p3 = scmp.lt.s32.totalorder (!%p139_p2), %s1556_s5, 63 }
   0xb   : > { %v2059_v0 = vld [vmem:[%s2782_s1 + $0x38] sm:$0xff]  ;;  %v2058_v3 = vld [vmem:[%s2782_s1 + $0x30] sm:$0xff]  ;;  %v2057_v6 = vld [vmem:[%s2782_s1 + $0x28] sm:$0xff]  ;;  %s2786_s5 = smov (!%p164_p3, %s1556_s5), 63  ;;  %vm913_vm0 = vcmask 130048   ;;  %vm1281_vm1 = vcmask 261120  }
   0xc   : > { %v2226_v1 = vld [vmem:[%s2782_s1 + $0xb8] sm:$0xff]  ;;  %938 = vmatpush.bf16.msra.mxu0 %v2059_v0  ;;  %2101 = vmatpush.bf16.msra.mxu3 %v2059_v0  ;;  %v2241_v4 = vld [vmem:[%s2782_s1 + $0xb0] sm:$0xff]  ;;  %v2256_v7 = vld [vmem:[%s2782_s1 + $0xa8] sm:$0xff]  ;;  %s2125_s22 = smul.u32 28, %s2786_s5 }
   0xd   : > { %v2231_v2 = vld [vmem:[%s2782_s1 + $0x78] sm:$0xff]  ;;  %2117 = vmatpush.bf16.msra.mxu2 %v2226_v1  ;;  %v2246_v5 = vld [vmem:[%s2782_s1 + $0x70] sm:$0xff]  ;;  %v2261_v8 = vld [vmem:[%s2782_s1 + $0x68] sm:$0xff] }
   0xe   : > { %2109 = vmatpush.bf16.msra.mxu1 %v2231_v2  ;;  %v2056_v9 = vld [vmem:[%s2782_s1 + $0x20] sm:$0xff]  ;;  %v2055_v12 = vld [vmem:[%s2782_s1 + $0x18] sm:$0xff]  ;;  %v2054_v15 = vld [vmem:[%s2782_s1 + $0x10] sm:$0xff]  ;;  %s2318_s4 = scalar_lea.vmem %s2781_s0, %s2125_s22 }
   0xf   : > { %v2272_v10 = vld [vmem:[%s2782_s1 + $0xa0] sm:$0xff]  ;;  %v2289_v13 = vld [vmem:[%s2782_s1 + $0x98] sm:$0xff]  ;;  %v2305_v16 = vld [vmem:[%s2782_s1 + $0x90] sm:$0xff] }
  0x10   : > { %939 = vmatpush.bf16.msra.mxu0 %v2058_v3  ;;  %2102 = vmatpush.bf16.msra.mxu3 %v2058_v3  ;;  %v2277_v11 = vld [vmem:[%s2782_s1 + $0x60] sm:$0xff]  ;;  %v2294_v14 = vld [vmem:[%s2782_s1 + $0x58] sm:$0xff]  ;;  %v2310_v17 = vld [vmem:[%s2782_s1 + $0x50] sm:$0xff] }
  0x11   : > { %2118 = vmatpush.bf16.msra.mxu2 %v2241_v4  ;;  %v2053_v18 = vld [vmem:[%s2782_s1 + $0x8] sm:$0xff]  ;;  %v2052_v21 = vld [vmem:[%s2782_s1] sm:$0xff]  ;;  %v1999_v25 = vld [vmem:[%s2318_s4 + $0x18] sm:$0xf0] }
  0x12   : > { %2110 = vmatpush.bf16.msra.mxu1 %v2246_v5  ;;  %v2325_v19 = vld [vmem:[%s2782_s1 + $0x88] sm:$0xff]  ;;  %v2338_v22 = vld [vmem:[%s2782_s1 + $0x80] sm:$0xff]  ;;  %v1618_v26 = vld [vmem:[%s2318_s4 + $0x70] sm:$0xf] }
  0x13   : > { %v2330_v20 = vld [vmem:[%s2782_s1 + $0x48] sm:$0xff]  ;;  %v2343_v23 = vld [vmem:[%s2782_s1 + $0x40] sm:$0xff]  ;;  %v1626_v28 = vld [vmem:[%s2318_s4 + $0x78] sm:$0xf] }
  0x14   : > { %940 = vmatpush.bf16.msra.mxu0 %v2057_v6  ;;  %2103 = vmatpush.bf16.msra.mxu3 %v2057_v6  ;;  %v1562_v24 = vld [vmem:[%s2318_s4] sm:$0xf]  ;;  %v2013_v27 = vld [vmem:[%s2318_s4 + $0x88] sm:$0xf0]  ;;  %v2014_v29 = vld [vmem:[%s2318_s4 + $0x90] sm:$0xf0] }
  0x15   : > { %2119 = vmatpush.bf16.msra.mxu2 %v2256_v7  ;;  %v2010_v30 = vld [vmem:[%s2318_s4 + $0x74] sm:$0xf]  ;;  %v1620_v31 = vld [vmem:[%s2318_s4 + $0x8c] sm:$0xf0]  ;;  %v2083_v32 = vld [vmem:[%s2782_s1 + $0xf8] sm:$0xff]  ;;  %v1563_v33 = vor.u32 %v1999_v25, %v1562_v24  ;;  %v1619_v34 = vor.u32 %v2013_v27, %v1618_v26  ;;  %v1627_v35 = vor.u32 %v2014_v29, %v1626_v28 }
  0x16   : > { %2111 = vmatpush.bf16.msra.mxu1 %v2261_v8  ;;  %v1623_v36 = vor.u32 %v2010_v30, %v1620_v31  ;;  %v2100_v37 = vld [vmem:[%s2782_s1 + $0x180] sm:$0xff]  ;;  %v2099_v38 = vld [vmem:[%s2782_s1 + $0x178] sm:$0xff]  ;;  %v2082_v39 = vld [vmem:[%s2782_s1 + $0xf0] sm:$0xff] }
  0x17   : > { %v2098_v40 = vld [vmem:[%s2782_s1 + $0x170] sm:$0xff]  ;;  %v2081_v41 = vld [vmem:[%s2782_s1 + $0xe8] sm:$0xff]  ;;  %v2080_v43 = vld [vmem:[%s2782_s1 + $0xe0] sm:$0xff] }
  0x18   : > { %941 = vmatpush.bf16.msra.mxu0 %v2056_v9  ;;  %2104 = vmatpush.bf16.msra.mxu3 %v2056_v9  ;;  %v2097_v42 = vld [vmem:[%s2782_s1 + $0x168] sm:$0xff]  ;;  %v1590_v44 = vld [vmem:[%s2318_s4 + $0x38] sm:$0xf]  ;;  %v2006_v45 = vld [vmem:[%s2318_s4 + $0x50] sm:$0xf0] }
  0x19   : > { %2120 = vmatpush.bf16.msra.mxu2 %v2272_v10  ;;  %v1646_v46 = vld [vmem:[%s2318_s4 + $0xa8] sm:$0xf]  ;;  %v2020_v47 = vld [vmem:[%s2318_s4 + $0xc0] sm:$0xf0]  ;;  %v1654_v48 = vld [vmem:[%s2318_s4 + $0xb0] sm:$0xf]  ;;  %v1591_v53 = vor.u32 %v2006_v45, %v1590_v44 }
  0x1a   : > { %2112 = vmatpush.bf16.msra.mxu1 %v2277_v11  ;;  %v2021_v49 = vld [vmem:[%s2318_s4 + $0xc8] sm:$0xf0]  ;;  %v1648_v51 = vld [vmem:[%s2318_s4 + $0xc4] sm:$0xf0]  ;;  %v2096_v52 = vld [vmem:[%s2782_s1 + $0x160] sm:$0xff]  ;;  %v1647_v54 = vor.u32 %v2020_v47, %v1646_v46 }
  0x1b   : > { %v2017_v50 = vld [vmem:[%s2318_s4 + $0xac] sm:$0xf]  ;;  %v1655_v55 = vor.u32 %v2021_v49, %v1654_v48  ;;  %v2079_v57 = vld [vmem:[%s2782_s1 + $0xd8] sm:$0xff]  ;;  %v2078_v59 = vld [vmem:[%s2782_s1 + $0xd0] sm:$0xff] }
  0x1c   : > { %942 = vmatpush.bf16.msra.mxu0 %v2055_v12  ;;  %2105 = vmatpush.bf16.msra.mxu3 %v2055_v12  ;;  %v1651_v56 = vor.u32 %v2017_v50, %v1648_v51  ;;  %v2095_v58 = vld [vmem:[%s2782_s1 + $0x158] sm:$0xff]  ;;  %v1674_v60 = vld [vmem:[%s2318_s4 + $0xe0] sm:$0xf]  ;;  %v1996_v62 = vld [vmem:[%s2318_s4 + $0x4] sm:$0xf] }
  0x1d   : > { %2121 = vmatpush.bf16.msra.mxu2 %v2289_v13  ;;  %v2027_v61 = vld [vmem:[%s2318_s4 + $0xf8] sm:$0xf0]  ;;  %v1564_v63 = vld [vmem:[%s2318_s4 + $0x1c] sm:$0xf0]  ;;  %v1682_v0 = vld [vmem:[%s2318_s4 + $0xe8] sm:$0xf] }
  0x1e   : > { %2113 = vmatpush.bf16.msra.mxu1 %v2294_v14  ;;  %v2024_v3 = vld [vmem:[%s2318_s4 + $0xe4] sm:$0xf]  ;;  %v1675_v6 = vor.u32 %v2027_v61, %v1674_v60  ;;  %v2094_v12 = vld [vmem:[%s2782_s1 + $0x150] sm:$0xff]  ;;  %v1704_v24 = vld [vmem:[%s2318_s4 + $0x134] sm:$0xf0] }
  0x1f   : > { %v2092_v28 = vld [vmem:[%s2782_s1 + $0x140] sm:$0xff]  ;;  %v1730_v29 = vld [vmem:[%s2318_s4 + $0x150] sm:$0xf]  ;;  %v2041_v30 = vld [vmem:[%s2318_s4 + $0x168] sm:$0xf0] }
  0x20   : > { %943 = vmatpush.bf16.msra.mxu0 %v2054_v15  ;;  %2106 = vmatpush.bf16.msra.mxu3 %v2054_v15  ;;  %v2034_v15 = vld [vmem:[%s2318_s4 + $0x130] sm:$0xf0]  ;;  %v1570_v31 = vld [vmem:[%s2318_s4 + $0x8] sm:$0xf]  ;;  %v1598_v44 = vld [vmem:[%s2318_s4 + $0x40] sm:$0xf] }
  0x21   : > { %2122 = vmatpush.bf16.msra.mxu2 %v2305_v16  ;;  %v2007_v45 = vld [vmem:[%s2318_s4 + $0x58] sm:$0xf0]  ;;  %v1766_v46 = vld [vmem:[%s2318_s4 + $0x190] sm:$0xf]  ;;  %v2049_v47 = vld [vmem:[%s2318_s4 + $0x1a8] sm:$0xf0] }
  0x22   : > { %2114 = vmatpush.bf16.msra.mxu1 %v2310_v17  ;;  %v2045_v48 = vld [vmem:[%s2318_s4 + $0x18c] sm:$0xf]  ;;  %v1760_v49 = vld [vmem:[%s2318_s4 + $0x1a4] sm:$0xf0]  ;;  %v2086_v50 = vld [vmem:[%s2782_s1 + $0x110] sm:$0xff] }
  0x23   : > { %v2001_v60 = vld [vmem:[%s2318_s4 + $0x28] sm:$0xf0]  ;;  %v1586_v61 = vld [vmem:[%s2318_s4 + $0x18] sm:$0xf] }
  0x24   : > { %944 = vmatpush.bf16.msra.mxu0 %v2053_v18  ;;  %2107 = vmatpush.bf16.msra.mxu3 %v2053_v18  ;;  %v1592_v18 = vld [vmem:[%s2318_s4 + $0x54] sm:$0xf0] }
  0x25   : > { %2123 = vmatpush.bf16.msra.mxu2 %v2325_v19 }
  0x26   : > { %2115 = vmatpush.bf16.msra.mxu1 %v2330_v20 }
  0x28   : > { %945 = vmatpush.bf16.msra.mxu0 %v2052_v21  ;;  %2108 = vmatpush.bf16.msra.mxu3 %v2052_v21  ;;  %v2035_v21 = vld [vmem:[%s2318_s4 + $0x138] sm:$0xf0] }
  0x29   : > { %2124 = vmatpush.bf16.msra.mxu2 %v2338_v22 }
  0x2a   : > { %2116 = vmatpush.bf16.msra.mxu1 %v2343_v23 }
  0x2b   : > { %946 = vmatmul.bf16.vlgmr.msra.gmra.mxu0 %v1563_v33  ;;  %956 = vmatmul.bf16.vlgmr.msra.gmra.mxu3 %v1619_v34  ;;  %v1738_v33 = vld [vmem:[%s2318_s4 + $0x158] sm:$0xf]  ;;  %v2038_v34 = vld [vmem:[%s2318_s4 + $0x154] sm:$0xf] }
  0x2c   : > { %1085 = vmatpush.bf16.msrb.mxu3 %v2083_v32  ;;  %987 = vmatpush.bf16.msrb.mxu0 %v2231_v2  ;;  %v2028_v2 = vld [vmem:[%s2318_s4 + $0x100] sm:$0xf0] }
  0x2d   : > { %1054 = vmatmul.bf16.vlgmr.msra.gmra.mxu2 %v1627_v35  ;;  %1005 = vmatmul.bf16.vlgmr.msra.gmra.mxu1 %v1623_v36  ;;  %v1683_v9 = vor.u32 %v2028_v2, %v1682_v0  ;;  %v2000_v32 = vld [vmem:[%s2318_s4 + $0x20] sm:$0xf0]  ;;  %v1732_v35 = vld [vmem:[%s2318_s4 + $0x16c] sm:$0xf0]  ;;  %v1731_v36 = vor.u32 %v2041_v30, %v1730_v29 }
  0x2e   : > { %1239 = vmatpush.bf16.msrb.mxu2 %v2100_v37  ;;  %1183 = vmatpush.bf16.msrb.mxu1 %v2099_v38  ;;  %v1571_v37 = vor.u32 %v2000_v32, %v1570_v31  ;;  %v1580_v0 = vld [vmem:[%s2318_s4 + $0x2c] sm:$0xf0] }
  0x30   : > { %988 = vmatpush.bf16.msrb.mxu0 %v2246_v5  ;;  %1086 = vmatpush.bf16.msrb.mxu3 %v2082_v39  ;;  %v1676_v5 = vld [vmem:[%s2318_s4 + $0xfc] sm:$0xf0]  ;;  %v1735_v39 = vor.u32 %v2038_v34, %v1732_v35 }
  0x32   : > { %1184 = vmatpush.bf16.msrb.mxu1 %v2098_v40  ;;  %v2088_v40 = vld [vmem:[%s2782_s1 + $0x120] sm:$0xff] }
  0x34   : > { %989 = vmatpush.bf16.msrb.mxu0 %v2261_v8  ;;  %1087 = vmatpush.bf16.msrb.mxu3 %v2081_v41  ;;  %v1567_v8 = vor.u32 %v1996_v62, %v1564_v63  ;;  %v2087_v41 = vld [vmem:[%s2782_s1 + $0x118] sm:$0xff]  ;;  %v2002_v62 = vld [vmem:[%s2318_s4 + $0x30] sm:$0xf0] }
  0x35   : > { %v1998_v63 = vld [vmem:[%s2318_s4 + $0x14] sm:$0xf] }
  0x36   : > { %1185 = vmatpush.bf16.msrb.mxu1 %v2097_v42  ;;  %v1758_v42 = vld [vmem:[%s2318_s4 + $0x188] sm:$0xf] }
  0x38   : > { %990 = vmatpush.bf16.msrb.mxu0 %v2277_v11  ;;  %1088 = vmatpush.bf16.msrb.mxu3 %v2080_v43  ;;  %v1679_v11 = vor.u32 %v2024_v3, %v1676_v5  ;;  %v2048_v43 = vld [vmem:[%s2318_s4 + $0x1a0] sm:$0xf0]  ;;  %v1587_v5 = vor.u32 %v2002_v62, %v1586_v61  ;;  %v2025_v61 = vld [vmem:[%s2318_s4 + $0xec] sm:$0xf]  ;;  %v1684_v62 = vld [vmem:[%s2318_s4 + $0x104] sm:$0xf0] }
  0x39   : > { %v1759_v51 = vor.u32 %v2048_v43, %v1758_v42  ;;  %v2023_v42 = vld [vmem:[%s2318_s4 + $0xd8] sm:$0xf0] }
  0x3a   : > { %1186 = vmatpush.bf16.msrb.mxu1 %v2096_v52  ;;  %v1599_v52 = vor.u32 %v2007_v45, %v1598_v44  ;;  %v2019_v43 = vld [vmem:[%s2318_s4 + $0xbc] sm:$0xf]  ;;  %v1664_v44 = vld [vmem:[%s2318_s4 + $0xd4] sm:$0xf0] }
  0x3b   : > { %951 = vmatmul.bf16.gmra.mxu0 %v1591_v53  ;;  %961 = vmatmul.bf16.gmra.mxu3 %v1647_v54  ;;  %v1767_v53 = vor.u32 %v2049_v47, %v1766_v46  ;;  %v1763_v54 = vor.u32 %v2045_v48, %v1760_v49 }
  0x3c   : > { %991 = vmatpush.bf16.msrb.mxu0 %v2294_v14  ;;  %1089 = vmatpush.bf16.msrb.mxu3 %v2079_v57  ;;  %v2077_v14 = vld [vmem:[%s2782_s1 + $0xc8] sm:$0xff] }
  0x3d   : > { %1059 = vmatmul.bf16.gmra.mxu2 %v1655_v55  ;;  %1010 = vmatmul.bf16.gmra.mxu1 %v1651_v56  ;;  %v2085_v55 = vld [vmem:[%s2782_s1 + $0x108] sm:$0xff]  ;;  %v2084_v56 = vld [vmem:[%s2782_s1 + $0x100] sm:$0xff] }
  0x3e   : > { %1187 = vmatpush.bf16.msrb.mxu1 %v2095_v58  ;;  %v1997_v57 = vld [vmem:[%s2318_s4 + $0xc] sm:$0xf]  ;;  %v1572_v58 = vld [vmem:[%s2318_s4 + $0x24] sm:$0xf0] }
  0x3f   : > { %v1575_v2 = vor.u32 %v1997_v57, %v1572_v58 }
  0x40   : > { %992 = vmatpush.bf16.msrb.mxu0 %v2310_v17  ;;  %1090 = vmatpush.bf16.msrb.mxu3 %v2078_v59  ;;  %v2003_v17 = vld [vmem:[%s2318_s4 + $0x3c] sm:$0xf]  ;;  %v1578_v59 = vld [vmem:[%s2318_s4 + $0x10] sm:$0xf] }
  0x41   : > { %v1595_v26 = vor.u32 %v2003_v17, %v1592_v18  ;;  %v1579_v3 = vor.u32 %v2001_v60, %v1578_v59  ;;  %v1608_v17 = vld [vmem:[%s2318_s4 + $0x64] sm:$0xf0] }
  0x42   : > { %1188 = vmatpush.bf16.msrb.mxu1 %v2094_v12  ;;  %v2008_v12 = vld [vmem:[%s2318_s4 + $0x60] sm:$0xf0] }
  0x44   : > { %993 = vmatpush.bf16.msrb.mxu0 %v2330_v20  ;;  %1091 = vmatpush.bf16.msrb.mxu3 %v2077_v14  ;;  %v1710_v20 = vld [vmem:[%s2318_s4 + $0x120] sm:$0xf]  ;;  %v1614_v14 = vld [vmem:[%s2318_s4 + $0x50] sm:$0xf] }
  0x45   : > { %v1711_v27 = vor.u32 %v2035_v21, %v1710_v20 }
  0x48   : > { %994 = vmatpush.bf16.msrb.mxu0 %v2343_v23  ;;  %v2031_v23 = vld [vmem:[%s2318_s4 + $0x11c] sm:$0xf] }
  0x4b   : > { %966 = vmatmul.bf16.gmra.mxu3 %v1675_v6  ;;  %995 = vmatmul.bf16.vlgmr.msrb.gmra.mxu0 %v1567_v8  ;;  %v1583_v6 = vor.u32 %v1998_v63, %v1580_v0  ;;  %v2004_v8 = vld [vmem:[%s2318_s4 + $0x44] sm:$0xf]  ;;  %v1690_v63 = vld [vmem:[%s2318_s4 + $0xf0] sm:$0xf]  ;;  %v2029_v0 = vld [vmem:[%s2318_s4 + $0x108] sm:$0xf0] }
  0x4c   : > { %1036 = vmatpush.bf16.msra.mxu0 %v2226_v1  ;;  %v1702_v1 = vld [vmem:[%s2318_s4 + $0x118] sm:$0xf] }
  0x4d   : > { %1064 = vmatmul.bf16.gmra.mxu2 %v1683_v9  ;;  %1015 = vmatmul.bf16.gmra.mxu1 %v1679_v11  ;;  %v1703_v25 = vor.u32 %v2034_v15, %v1702_v1  ;;  %v1600_v9 = vld [vmem:[%s2318_s4 + $0x5c] sm:$0xf0]  ;;  %v1606_v11 = vld [vmem:[%s2318_s4 + $0x48] sm:$0xf]  ;;  %v2009_v1 = vld [vmem:[%s2318_s4 + $0x68] sm:$0xf0] }
  0x4e   : > { %v2005_v15 = vld [vmem:[%s2318_s4 + $0x4c] sm:$0xf]  ;;  %v1603_v18 = vor.u32 %v2004_v8, %v1600_v9  ;;  %v1607_v20 = vor.u32 %v2008_v12, %v1606_v11  ;;  %v1615_v21 = vor.u32 %v2009_v1, %v1614_v14  ;;  %v1687_v12 = vor.u32 %v2025_v61, %v1684_v62 }
  0x4f   : > { %v1691_v14 = vor.u32 %v2029_v0, %v1690_v63 }
  0x50   : > { %1037 = vmatpush.bf16.msra.mxu0 %v2241_v4  ;;  %v1707_v4 = vor.u32 %v2031_v23, %v1704_v24  ;;  %v1611_v23 = vor.u32 %v2005_v15, %v1608_v17  ;;  %v2011_v24 = vld [vmem:[%s2318_s4 + $0x7c] sm:$0xf] }
  0x54   : > { %1038 = vmatpush.bf16.msra.mxu0 %v2256_v7  ;;  %v2093_v7 = vld [vmem:[%s2782_s1 + $0x148] sm:$0xff] }
  0x55   : > { %1189 = vmatpush.bf16.msrb.mxu1 %v2093_v7  ;;  %v2016_v7 = vld [vmem:[%s2318_s4 + $0xa0] sm:$0xf0] }
  0x58   : > { %1039 = vmatpush.bf16.msra.mxu0 %v2272_v10  ;;  %v2076_v10 = vld [vmem:[%s2782_s1 + $0xc0] sm:$0xff] }
  0x59   : > { %1092 = vmatpush.bf16.msrb.mxu3 %v2076_v10  ;;  %1190 = vmatpush.bf16.msrb.mxu1 %v2092_v28  ;;  %v2012_v10 = vld [vmem:[%s2318_s4 + $0x84] sm:$0xf] }
  0x5b   : > { %971 = vmatmul.bf16.gmra.mxu3 %v1703_v25  ;;  %1000 = vmatmul.bf16.gmra.mxu0 %v1595_v26  ;;  %v1628_v25 = vld [vmem:[%s2318_s4 + $0x94] sm:$0xf0]  ;;  %v1634_v26 = vld [vmem:[%s2318_s4 + $0x80] sm:$0xf] }
  0x5c   : > { %1040 = vmatpush.bf16.msra.mxu0 %v2289_v13  ;;  %v2091_v13 = vld [vmem:[%s2782_s1 + $0x138] sm:$0xff]  ;;  %v1631_v28 = vor.u32 %v2011_v24, %v1628_v25 }
  0x5d   : > { %1069 = vmatmul.bf16.gmra.mxu2 %v1711_v27  ;;  %1020 = vmatmul.bf16.gmra.mxu1 %v1707_v4  ;;  %v2015_v27 = vld [vmem:[%s2318_s4 + $0x98] sm:$0xf0]  ;;  %v1642_v4 = vld [vmem:[%s2318_s4 + $0x88] sm:$0xf] }
  0x5e   : > { %v1635_v29 = vor.u32 %v2015_v27, %v1634_v26  ;;  %v1643_v31 = vor.u32 %v2016_v7, %v1642_v4  ;;  %v2032_v4 = vld [vmem:[%s2318_s4 + $0x124] sm:$0xf]  ;;  %v1712_v7 = vld [vmem:[%s2318_s4 + $0x13c] sm:$0xf0] }
  0x60   : > { %1041 = vmatpush.bf16.msra.mxu0 %v2305_v16  ;;  %v2042_v16 = vld [vmem:[%s2318_s4 + $0x170] sm:$0xf0] }
  0x61   : > { %v1739_v38 = vor.u32 %v2042_v16, %v1738_v33 }
  0x64   : > { %1042 = vmatpush.bf16.msra.mxu0 %v2325_v19  ;;  %v2090_v19 = vld [vmem:[%s2782_s1 + $0x130] sm:$0xff] }
  0x68   : > { %1043 = vmatpush.bf16.msra.mxu0 %v2338_v22  ;;  %v2089_v22 = vld [vmem:[%s2782_s1 + $0x128] sm:$0xff] }
  0x6b   : > { %976 = vmatmul.bf16.gmra.mxu3 %v1731_v36  ;;  %1044 = vmatmul.bf16.vlgmr.msra.gmra.mxu0 %v1571_v37 }
  0x6c   : > { %1134 = vmatpush.bf16.msrb.mxu0 %v2091_v13  ;;  %v1636_v13 = vld [vmem:[%s2318_s4 + $0x9c] sm:$0xf0] }
  0x6d   : > { %1074 = vmatmul.bf16.gmra.mxu2 %v1739_v38  ;;  %1025 = vmatmul.bf16.gmra.mxu1 %v1735_v39  ;;  %v1639_v32 = vor.u32 %v2012_v10, %v1636_v13  ;;  %v2018_v38 = vld [vmem:[%s2318_s4 + $0xb4] sm:$0xf]  ;;  %v1656_v39 = vld [vmem:[%s2318_s4 + $0xcc] sm:$0xf0]  ;;  %v1718_v10 = vld [vmem:[%s2318_s4 + $0x128] sm:$0xf] }
  0x6e   : > { %v1659_v48 = vor.u32 %v2018_v38, %v1656_v39  ;;  %v2036_v13 = vld [vmem:[%s2318_s4 + $0x140] sm:$0xf0] }
  0x70   : > { %1135 = vmatpush.bf16.msrb.mxu0 %v2090_v19 }
  0x74   : > { %1136 = vmatpush.bf16.msrb.mxu0 %v2089_v22  ;;  %v1662_v22 = vld [vmem:[%s2318_s4 + $0xb8] sm:$0xf] }
  0x78   : > { %1137 = vmatpush.bf16.msrb.mxu0 %v2088_v40  ;;  %v2022_v40 = vld [vmem:[%s2318_s4 + $0xd0] sm:$0xf0] }
  0x79   : > { %v1663_v49 = vor.u32 %v2022_v40, %v1662_v22 }
  0x7b   : > { %981 = vmatmul.bf16.gmra.mxu3 %v1759_v51  ;;  %1049 = vmatmul.bf16.gmra.mxu0 %v1599_v52  ;;  %v1667_v52 = vor.u32 %v2019_v43, %v1664_v44 }
  0x7c   : > { %1138 = vmatpush.bf16.msrb.mxu0 %v2087_v41  ;;  %v1670_v41 = vld [vmem:[%s2318_s4 + $0xc0] sm:$0xf] }
  0x7d   : > { %1079 = vmatmul.bf16.gmra.mxu2 %v1767_v53  ;;  %1030 = vmatmul.bf16.gmra.mxu1 %v1763_v54  ;;  %v1671_v51 = vor.u32 %v2023_v42, %v1670_v41 }
  0x80   : > { %1139 = vmatpush.bf16.msrb.mxu0 %v2086_v50 }
  0x84   : > { %1140 = vmatpush.bf16.msrb.mxu0 %v2085_v55 }
  0x88   : > { %1141 = vmatpush.bf16.msrb.mxu0 %v2084_v56 }
  0x8b   : > { %1093 = vmatmul.bf16.vlgmr.msrb.gmra.mxu3 %v1575_v2  ;;  %1142 = vmatmul.bf16.vlgmr.msrb.gmra.mxu0 %v1579_v3  ;;  %v1698_v2 = vld [vmem:[%s2318_s4 + $0xf8] sm:$0xf]  ;;  %v2030_v3 = vld [vmem:[%s2318_s4 + $0x110] sm:$0xf0] }
  0x8c   : > { %v1699_v15 = vor.u32 %v2030_v3, %v1698_v2 }
  0x8d   : > { %1980 = vmatmul.msk.bf16.vlgmr.msrb.gmra.mxu2 %vm913_vm0, %v1587_v5  ;;  %1191 = vmatmul.bf16.vlgmr.msrb.gmra.mxu1 %v1583_v6  ;;  %v2026_v5 = vld [vmem:[%s2318_s4 + $0xf4] sm:$0xf]  ;;  %v1692_v6 = vld [vmem:[%s2318_s4 + $0x10c] sm:$0xf0] }
  0x8e   : > { %v1695_v17 = vor.u32 %v2026_v5, %v1692_v6 }
  0x9b   : > { %1098 = vmatmul.bf16.gmra.mxu3 %v1603_v18  ;;  %1147 = vmatmul.bf16.gmra.mxu0 %v1607_v20 }
  0x9d   : > { %1981 = vmatmul.msk.bf16.gmra.mxu2 %vm913_vm0, %v1615_v21  ;;  %1196 = vmatmul.bf16.gmra.mxu1 %v1611_v23 }
  0xa8   : > { %v2514_v30 = vpop.f32.mrf.mxu0 }
  0xaa   : > { %v1006_v33 = vpop.f32.mrf.mxu1 }
  0xab   : > { %1103 = vmatmul.bf16.gmra.mxu3 %v1631_v28  ;;  %1152 = vmatmul.bf16.gmra.mxu0 %v1635_v29  ;;  %v1726_v28 = vld [vmem:[%s2318_s4 + $0x130] sm:$0xf]  ;;  %v2037_v29 = vld [vmem:[%s2318_s4 + $0x148] sm:$0xf0] }
  0xac   : > { %v1727_v39 = vor.u32 %v2037_v29, %v1726_v28 }
  0xad   : > { %1982 = vmatmul.msk.bf16.gmra.mxu2 %vm913_vm0, %v1643_v31  ;;  %1201 = vmatmul.bf16.gmra.mxu1 %v1639_v32  ;;  %v2033_v31 = vld [vmem:[%s2318_s4 + $0x12c] sm:$0xf]  ;;  %v1720_v32 = vld [vmem:[%s2318_s4 + $0x144] sm:$0xf0] }
  0xae   : > { %v957_v16 = vpop.f32.mrf.mxu3  ;;  %v1723_v22 = vor.u32 %v2033_v31, %v1720_v32 }
  0xaf   : > { %v1007_v34 = vadd.f32 %v1006_v33, %v957_v16 }
  0xb0   : > { %v1055_v35 = vpop.f32.mrf.mxu2  ;;  %v2517_v19 = vpop.f32.mrf.mxu0 }
  0xb1   : > { %v2519_v36 = vadd.f32 %v1055_v35, %v1007_v34  ;;  %v1715_v35 = vor.u32 %v2032_v4, %v1712_v7  ;;  %v2051_v4 = vld [vmem:[%s2318_s4 + $0x1b8] sm:$0xf0] }
  0xb2   : > { %v1008_v37 = vpop.f32.mrf.mxu1  ;;  %v2047_v7 = vld [vmem:[%s2318_s4 + $0x19c] sm:$0xf] }
  0xb6   : > { %v959_v45 = vpop.f32.mrf.mxu3 }
  0xb7   : > { %v1009_v46 = vadd.f32 %v1008_v37, %v959_v45  ;;  %v1719_v37 = vor.u32 %v2036_v13, %v1718_v10  ;;  %v1776_v10 = vld [vmem:[%s2318_s4 + $0x1b4] sm:$0xf0] }
  0xb8   : > { %v1057_v47 = vpop.f32.mrf.mxu2  ;;  %v2529_v50 = vpop.f32.mrf.mxu0 }
  0xb9   : > { %v2531_v53 = vadd.f32 %v1057_v47, %v1009_v46 }
  0xba   : > { %v1011_v54 = vpop.f32.mrf.mxu1 }
  0xbb   : > { %1108 = vmatmul.bf16.gmra.mxu3 %v1659_v48  ;;  %1157 = vmatmul.bf16.gmra.mxu0 %v1663_v49  ;;  %v2039_v48 = vld [vmem:[%s2318_s4 + $0x15c] sm:$0xf]  ;;  %v1740_v49 = vld [vmem:[%s2318_s4 + $0x174] sm:$0xf0] }
  0xbc   : > { %v1743_v63 = vor.u32 %v2039_v48, %v1740_v49 }
  0xbd   : > { %1983 = vmatmul.msk.bf16.gmra.mxu2 %vm913_vm0, %v1671_v51  ;;  %1206 = vmatmul.bf16.gmra.mxu1 %v1667_v52  ;;  %v1746_v51 = vld [vmem:[%s2318_s4 + $0x160] sm:$0xf]  ;;  %v2043_v52 = vld [vmem:[%s2318_s4 + $0x178] sm:$0xf0] }
  0xbe   : > { %v962_v55 = vpop.f32.mrf.mxu3  ;;  %v1747_v0 = vor.u32 %v2043_v52, %v1746_v51 }
  0xbf   : > { %v1012_v56 = vadd.f32 %v1011_v54, %v962_v55  ;;  %v1754_v54 = vld [vmem:[%s2318_s4 + $0x168] sm:$0xf]  ;;  %v2044_v55 = vld [vmem:[%s2318_s4 + $0x180] sm:$0xf0] }
  0xc0   : > { %v1060_v57 = vpop.f32.mrf.mxu2  ;;  %v2534_v58 = vpop.f32.mrf.mxu0  ;;  %v1755_v3 = vor.u32 %v2044_v55, %v1754_v54 }
  0xc1   : > { %v2536_v59 = vadd.f32 %v1060_v57, %v1012_v56  ;;  %v2040_v56 = vld [vmem:[%s2318_s4 + $0x164] sm:$0xf]  ;;  %v1748_v57 = vld [vmem:[%s2318_s4 + $0x17c] sm:$0xf0] }
  0xc2   : > { %v1013_v60 = vpop.f32.mrf.mxu1  ;;  %v1751_v5 = vor.u32 %v2040_v56, %v1748_v57 }
  0xc6   : > { %v964_v8 = vpop.f32.mrf.mxu3 }
  0xc7   : > { %v1014_v9 = vadd.f32 %v1013_v60, %v964_v8 }
  0xc8   : > { %v1062_v11 = vpop.f32.mrf.mxu2  ;;  %v2546_v1 = vpop.f32.mrf.mxu0 }
  0xc9   : > { %v2548_v18 = vadd.f32 %v1062_v11, %v1014_v9  ;;  %v997_v55 = vadd.f32 %v2546_v1, %v2514_v30 }
  0xca   : > { %v1016_v20 = vpop.f32.mrf.mxu1 }
  0xcb   : > { %1113 = vmatmul.bf16.gmra.mxu3 %v1687_v12  ;;  %1162 = vmatmul.bf16.gmra.mxu0 %v1691_v14 }
  0xcd   : > { %1984 = vmatmul.msk.bf16.gmra.mxu2 %vm913_vm0, %v1699_v15  ;;  %1211 = vmatmul.bf16.gmra.mxu1 %v1695_v17 }
  0xce   : > { %v967_v21 = vpop.f32.mrf.mxu3 }
  0xcf   : > { %v1017_v23 = vadd.f32 %v1016_v20, %v967_v21  ;;  %v2046_v20 = vld [vmem:[%s2318_s4 + $0x194] sm:$0xf]  ;;  %v1768_v21 = vld [vmem:[%s2318_s4 + $0x1ac] sm:$0xf0] }
  0xd0   : > { %v1065_v24 = vpop.f32.mrf.mxu2  ;;  %v2551_v25 = vpop.f32.mrf.mxu0  ;;  %v1771_v31 = vor.u32 %v2046_v20, %v1768_v21 }
  0xd1   : > { %v2553_v26 = vadd.f32 %v1065_v24, %v1017_v23  ;;  %v1774_v23 = vld [vmem:[%s2318_s4 + $0x198] sm:$0xf]  ;;  %v2050_v24 = vld [vmem:[%s2318_s4 + $0x1b0] sm:$0xf0] }
  0xd2   : > { %v1018_v27 = vpop.f32.mrf.mxu1  ;;  %v1775_v32 = vor.u32 %v2050_v24, %v1774_v23 }
  0xd6   : > { %v969_v33 = vpop.f32.mrf.mxu3 }
  0xd7   : > { %v1019_v16 = vadd.f32 %v1018_v27, %v969_v33  ;;  %v1782_v27 = vld [vmem:[%s2318_s4 + $0x1a0] sm:$0xf]  ;;  %s1559_s4 = sshll.u32 %s2786_s5, 3 }
  0xd8   : > { %v1067_v34 = vpop.f32.mrf.mxu2  ;;  %v2563_v38 = vpop.f32.mrf.mxu0  ;;  %s2608_s24 = scalar_lea.vmem %s2783_s2, %s1559_s4 }
  0xd9   : > { %v2565_v40 = vadd.f32 %v1067_v34, %v1019_v16  ;;  %v1783_v16 = vor.u32 %v2051_v4, %v1782_v27  ;;  %v1779_v34 = vor.u32 %v2047_v7, %v1776_v10 }
  0xda   : > { %v1021_v41 = vpop.f32.mrf.mxu1 }
  0xdb   : > { %1118 = vmatmul.bf16.gmra.mxu3 %v1715_v35  ;;  %1167 = vmatmul.bf16.gmra.mxu0 %v1719_v37 }
  0xdd   : > { %1985 = vmatmul.msk.bf16.gmra.mxu2 %vm913_vm0, %v1727_v39  ;;  %1216 = vmatmul.bf16.gmra.mxu1 %v1723_v22 }
  0xde   : > { %v972_v42 = vpop.f32.mrf.mxu3 }
  0xdf   : > { %v1022_v43 = vadd.f32 %v1021_v41, %v972_v42 }
  0xe0   : > { %v1070_v44 = vpop.f32.mrf.mxu2  ;;  %v2568_v45 = vpop.f32.mrf.mxu0 }
  0xe1   : > { %v2570_v46 = vadd.f32 %v1070_v44, %v1022_v43  ;;  %v1004_v10 = vadd.f32 %v2568_v45, %v2534_v58 }
  0xe2   : > { %v1023_v47 = vpop.f32.mrf.mxu1 }
  0xe6   : > { %v974_v60 = vpop.f32.mrf.mxu3 }
  0xe7   : > { %v1024_v61 = vadd.f32 %v1023_v47, %v974_v60 }
  0xe8   : > { %v1072_v62 = vpop.f32.mrf.mxu2  ;;  %v1045_v2 = vpop.f32.mrf.mxu0 }
  0xe9   : > { %v2580_v6 = vadd.f32 %v1072_v62, %v1024_v61  ;;  %v1046_v56 = vadd.f32 %v1045_v2, %v997_v55 }
  0xea   : > { %v1026_v8 = vpop.f32.mrf.mxu1 }
  0xeb   : > { %1123 = vmatmul.bf16.gmra.mxu3 %v1743_v63  ;;  %1172 = vmatmul.bf16.gmra.mxu0 %v1747_v0 }
  0xed   : > { %1986 = vmatmul.msk.bf16.gmra.mxu2 %vm913_vm0, %v1755_v3  ;;  %1221 = vmatmul.bf16.gmra.mxu1 %v1751_v5  ;;  %v999_v3 = vadd.f32 %v2551_v25, %v2517_v19 }
  0xee   : > { %v977_v9 = vpop.f32.mrf.mxu3 }
  0xef   : > { %v1027_v11 = vadd.f32 %v1026_v8, %v977_v9 }
  0xf0   : > { %v1075_v12 = vpop.f32.mrf.mxu2  ;;  %v1047_v14 = vpop.f32.mrf.mxu0 }
  0xf1   : > { %v2583_v15 = vadd.f32 %v1075_v12, %v1027_v11  ;;  %v1048_v30 = vadd.f32 %v1047_v14, %v999_v3  ;;  %v1002_v12 = vadd.f32 %v2563_v38, %v2529_v50 }
  0xf2   : > { %v1028_v17 = vpop.f32.mrf.mxu1 }
  0xf6   : > { %v979_v13 = vpop.f32.mrf.mxu3 }
  0xf7   : > { %v1029_v28 = vadd.f32 %v1028_v17, %v979_v13 }
  0xf8   : > { %v1077_v29 = vpop.f32.mrf.mxu2  ;;  %v1050_v33 = vpop.f32.mrf.mxu0 }
  0xf9   : > { %v2593_v35 = vadd.f32 %v1077_v29, %v1029_v28  ;;  %v1051_v20 = vadd.f32 %v1050_v33, %v1002_v12 }
  0xfa   : > { %v1031_v37 = vpop.f32.mrf.mxu1 }
  0xfb   : > { %1128 = vmatmul.bf16.gmra.mxu3 %v1771_v31  ;;  %1177 = vmatmul.bf16.gmra.mxu0 %v1775_v32 }
  0xfd   : > { %1987 = vmatmul.msk.bf16.gmra.mxu2 %vm913_vm0, %v1783_v16  ;;  %1226 = vmatmul.bf16.gmra.mxu1 %v1779_v34 }
  0xfe   : > { %v982_v39 = vpop.f32.mrf.mxu3 }
  0xff   : > { %v1032_v22 = vadd.f32 %v1031_v37, %v982_v39 }
 0x100   : > { %v1080_v41 = vpop.f32.mrf.mxu2  ;;  %v1052_v42 = vpop.f32.mrf.mxu0 }
 0x101   : > { %v2596_v43 = vadd.f32 %v1080_v41, %v1032_v22  ;;  %v1053_v50 = vadd.f32 %v1052_v42, %v1004_v10 }
 0x102   : > { %v1033_v44 = vpop.f32.mrf.mxu1 }
 0x106   : > { %v984_v47 = vpop.f32.mrf.mxu3 }
 0x107   : > { %v1034_v48 = vadd.f32 %v1033_v44, %v984_v47 }
 0x108   : > { %v1082_v49 = vpop.f32.mrf.mxu2  ;;  %v1143_v51 = vpop.f32.mrf.mxu0 }
 0x109   : > { %v2598_v52 = vadd.f32 %v1082_v49, %v1034_v48 }
 0x10a   : > { %v1192_v54 = vpop.f32.mrf.mxu1 }
 0x10e   : > { %v1094_v57 = vpop.f32.mrf.mxu3 }
 0x10f   : > { %v1095_v60 = vadd.f32 %v1094_v57, %v1046_v56 }
 0x110   : > { %v1241_v61 = vpop.f32.mrf.mxu2  ;;  %v1145_v62 = vpop.f32.mrf.mxu0 }
 0x111   : > { %v1144_v63 = vadd.f32 %v1143_v51, %v1095_v60 }
 0x112   : > { %v1194_v0 = vpop.f32.mrf.mxu1 }
 0x113   : > { %v1193_v5 = vadd.f32 %v1192_v54, %v1144_v63 }
 0x115   : > { %v2610_v1 = vadd.f32 %v1241_v61, %v1193_v5 }
 0x116   : > { %v1096_v2 = vpop.f32.mrf.mxu3 }
 0x117   : > { %1282 = vst.msk [vmem:[%s2608_s24] sm:$0xff] %vm1281_vm1, %v2610_v1  ;;  %v1097_v8 = vadd.f32 %v1096_v2, %v1048_v30 }
 0x118   : > { %v1243_v9 = vpop.f32.mrf.mxu2  ;;  %v1148_v11 = vpop.f32.mrf.mxu0 }
 0x119   : > { %v1146_v19 = vadd.f32 %v1145_v62, %v1097_v8 }
 0x11a   : > { %v1197_v25 = vpop.f32.mrf.mxu1 }
 0x11b   : > { %v1195_v17 = vadd.f32 %v1194_v0, %v1146_v19 }
 0x11d   : > { %v2617_v21 = vadd.f32 %v1243_v9, %v1195_v17 }
 0x11e   : > { %v1099_v14 = vpop.f32.mrf.mxu3 }
 0x11f   : > { %1283 = vst.msk [vmem:[%s2608_s24 + $0x8] sm:$0xff] %vm1281_vm1, %v2617_v21  ;;  %v1100_v23 = vadd.f32 %v1099_v14, %v1051_v20 }
 0x120   : > { %v1246_v24 = vpop.f32.mrf.mxu2  ;;  %v1150_v27 = vpop.f32.mrf.mxu0 }
 0x121   : > { %v1149_v4 = vadd.f32 %v1148_v11, %v1100_v23 }
 0x122   : > { %v1199_v7 = vpop.f32.mrf.mxu1 }
 0x123   : > { %v1198_v13 = vadd.f32 %v1197_v25, %v1149_v4 }
 0x125   : > { %v2624_v38 = vadd.f32 %v1246_v24, %v1198_v13 }
 0x126   : > { %v1101_v28 = vpop.f32.mrf.mxu3 }
 0x127   : > { %1284 = vst.msk [vmem:[%s2608_s24 + $0x10] sm:$0xff] %vm1281_vm1, %v2624_v38  ;;  %v1102_v29 = vadd.f32 %v1101_v28, %v1053_v50  ;;  %v1299_v50 = vsel %vm1281_vm1, %v2617_v21, 0.0 }
 0x128   : > { %v1248_v31 = vpop.f32.mrf.mxu2  ;;  %v1153_v32 = vpop.f32.mrf.mxu0 }
 0x129   : > { %v1151_v33 = vadd.f32 %v1150_v27, %v1102_v29  ;;  %v1298_v29 = vsel %vm1281_vm1, %v2610_v1, 0.0 }
 0x12a   : > { %v1202_v16 = vpop.f32.mrf.mxu1 }
 0x12b   : > { %v1200_v34 = vadd.f32 %v1199_v7, %v1151_v33  ;;  %v1300_v33 = vadd.f32 %v1299_v50, %v1298_v29 }
 0x12d   : > { %v2629_v37 = vadd.f32 %v1248_v31, %v1200_v34  ;;  %v1301_v31 = vsel %vm1281_vm1, %v2624_v38, 0.0 }
 0x12e   : > { %v1104_v39 = vpop.f32.mrf.mxu3 }
 0x12f   : > { %1285 = vst.msk [vmem:[%s2608_s24 + $0x18] sm:$0xff] %vm1281_vm1, %v2629_v37  ;;  %v1105_v58 = vadd.f32 %v1104_v39, %v2519_v36 }
 0x130   : > { %v1251_v45 = vpop.f32.mrf.mxu2  ;;  %v1155_v22 = vpop.f32.mrf.mxu0 }
 0x131   : > { %v1154_v41 = vadd.f32 %v1153_v32, %v1105_v58 }
 0x132   : > { %v1204_v42 = vpop.f32.mrf.mxu1 }
 0x133   : > { %v1203_v44 = vadd.f32 %v1202_v16, %v1154_v41  ;;  %v1303_v16 = vsel %vm1281_vm1, %v2629_v37, 0.0 }
 0x135   : > { %v2635_v47 = vadd.f32 %v1251_v45, %v1203_v44 }
 0x136   : > { %v1106_v48 = vpop.f32.mrf.mxu3 }
 0x137   : > { %1286 = vst.msk [vmem:[%s2608_s24 + $0x20] sm:$0xff] %vm1281_vm1, %v2635_v47  ;;  %v1107_v49 = vadd.f32 %v1106_v48, %v2531_v53  ;;  %v1305_v58 = vsel %vm1281_vm1, %v2635_v47, 0.0 }
 0x138   : > { %v1253_v51 = vpop.f32.mrf.mxu2  ;;  %v1158_v54 = vpop.f32.mrf.mxu0 }
 0x139   : > { %v1156_v55 = vadd.f32 %v1155_v22, %v1107_v49 }
 0x13a   : > { %v1207_v56 = vpop.f32.mrf.mxu1 }
 0x13b   : > { %v1205_v36 = vadd.f32 %v1204_v42, %v1156_v55 }
 0x13d   : > { %v2641_v57 = vadd.f32 %v1253_v51, %v1205_v36 }
 0x13e   : > { %v1109_v60 = vpop.f32.mrf.mxu3 }
 0x13f   : > { %1287 = vst.msk [vmem:[%s2608_s24 + $0x28] sm:$0xff] %vm1281_vm1, %v2641_v57  ;;  %v1110_v61 = vadd.f32 %v1109_v60, %v2536_v59  ;;  %v1307_v44 = vsel %vm1281_vm1, %v2641_v57, 0.0 }
 0x140   : > { %v1256_v62 = vpop.f32.mrf.mxu2  ;;  %v1160_v63 = vpop.f32.mrf.mxu0 }
 0x141   : > { %v1159_v0 = vadd.f32 %v1158_v54, %v1110_v61 }
 0x142   : > { %v1209_v3 = vpop.f32.mrf.mxu1 }
 0x143   : > { %v1208_v53 = vadd.f32 %v1207_v56, %v1159_v0 }
 0x145   : > { %v2647_v5 = vadd.f32 %v1256_v62, %v1208_v53 }
 0x146   : > { %v1111_v30 = vpop.f32.mrf.mxu3 }
 0x147   : > { %1288 = vst.msk [vmem:[%s2608_s24 + $0x30] sm:$0xff] %vm1281_vm1, %v2647_v5  ;;  %v1112_v2 = vadd.f32 %v1111_v30, %v2548_v18  ;;  %v1309_v54 = vsel %vm1281_vm1, %v2647_v5, 0.0 }
 0x148   : > { %v1258_v8 = vpop.f32.mrf.mxu2  ;;  %v1163_v9 = vpop.f32.mrf.mxu0 }
 0x149   : > { %v1161_v11 = vadd.f32 %v1160_v63, %v1112_v2 }
 0x14a   : > { %v1212_v19 = vpop.f32.mrf.mxu1 }
 0x14b   : > { %v1210_v59 = vadd.f32 %v1209_v3, %v1161_v11 }
 0x14d   : > { %v2653_v25 = vadd.f32 %v1258_v8, %v1210_v59 }
 0x14e   : > { %v1114_v12 = vpop.f32.mrf.mxu3 }
 0x14f   : > { %1289 = vst.msk [vmem:[%s2608_s24 + $0x38] sm:$0xff] %vm1281_vm1, %v2653_v25  ;;  %v1115_v17 = vadd.f32 %v1114_v12, %v2553_v26  ;;  %v1311_v36 = vsel %vm1281_vm1, %v2653_v25, 0.0 }
 0x150   : > { %v1261_v20 = vpop.f32.mrf.mxu2  ;;  %v1165_v14 = vpop.f32.mrf.mxu0 }
 0x151   : > { %v1164_v23 = vadd.f32 %v1163_v9, %v1115_v17 }
 0x152   : > { %v1214_v24 = vpop.f32.mrf.mxu1 }
 0x153   : > { %v1213_v27 = vadd.f32 %v1212_v19, %v1164_v23 }
 0x155   : > { %v2659_v18 = vadd.f32 %v1261_v20, %v1213_v27 }
 0x156   : > { %v1116_v4 = vpop.f32.mrf.mxu3 }
 0x157   : > { %1290 = vst.msk [vmem:[%s2608_s24 + $0x40] sm:$0xff] %vm1281_vm1, %v2659_v18  ;;  %v1117_v7 = vadd.f32 %v1116_v4, %v2565_v40  ;;  %v1302_v40 = vadd.f32 %v1301_v31, %v1300_v33  ;;  %v1313_v62 = vsel %vm1281_vm1, %v2659_v18, 0.0 }
 0x158   : > { %v1263_v10 = vpop.f32.mrf.mxu2  ;;  %v1168_v13 = vpop.f32.mrf.mxu0 }
 0x159   : > { %v1166_v26 = vadd.f32 %v1165_v14, %v1117_v7  ;;  %v1304_v41 = vadd.f32 %v1303_v16, %v1302_v40 }
 0x15a   : > { %v1217_v28 = vpop.f32.mrf.mxu1 }
 0x15b   : > { %v1215_v32 = vadd.f32 %v1214_v24, %v1166_v26  ;;  %v1306_v49 = vadd.f32 %v1305_v58, %v1304_v41 }
 0x15d   : > { %v2673_v34 = vadd.f32 %v1263_v10, %v1215_v32  ;;  %v1308_v56 = vadd.f32 %v1307_v44, %v1306_v49  ;;  %v2188_v44 = vmov 128.0  }
 0x15e   : > { %v1119_v39 = vpop.f32.mrf.mxu3  ;;  %2144 = vrcp.f32 %v2188_v44 }
 0x15f   : > { %1291 = vst.msk [vmem:[%s2608_s24 + $0x48] sm:$0xff] %vm1281_vm1, %v2673_v34  ;;  %v1120_v45 = vadd.f32 %v1119_v39, %v2570_v46  ;;  %v1310_v46 = vadd.f32 %v1309_v54, %v1308_v56  ;;  %v1315_v53 = vsel %vm1281_vm1, %v2673_v34, 0.0 }
 0x160   : > { %v1266_v22 = vpop.f32.mrf.mxu2  ;;  %v1170_v42 = vpop.f32.mrf.mxu0 }
 0x161   : > { %v1169_v48 = vadd.f32 %v1168_v13, %v1120_v45  ;;  %v1312_v3 = vadd.f32 %v1311_v36, %v1310_v46 }
 0x162   : > { %v1219_v51 = vpop.f32.mrf.mxu1 }
 0x163   : > { %v1218_v55 = vadd.f32 %v1217_v28, %v1169_v48  ;;  %v1314_v2 = vadd.f32 %v1313_v62, %v1312_v3 }
 0x165   : > { %v2687_v60 = vadd.f32 %v1266_v22, %v1218_v55  ;;  %v1316_v19 = vadd.f32 %v1315_v53, %v1314_v2  ;;  %v2145_v55 = vpop.eup %2144 }
 0x166   : > { %v1121_v61 = vpop.f32.mrf.mxu3  ;;  %v1336_v62 = vmul.f32 128.0, %v2145_v55  ;;  %vm1340_vm2 = vweird.f32 %v2145_v55 }
 0x167   : > { %1292 = vst.msk [vmem:[%s2608_s24 + $0x50] sm:$0xff] %vm1281_vm1, %v2687_v60  ;;  %v1122_v63 = vadd.f32 %v1121_v61, %v2580_v6  ;;  %v1317_v9 = vsel %vm1281_vm1, %v2687_v60, 0.0 }
 0x168   : > { %v1268_v0 = vpop.f32.mrf.mxu2  ;;  %v1173_v8 = vpop.f32.mrf.mxu0  ;;  %v1318_v17 = vadd.f32 %v1317_v9, %v1316_v19  ;;  %v1337_v53 = vsub.f32 1.0, %v1336_v62 }
 0x169   : > { %v1171_v30 = vadd.f32 %v1170_v42, %v1122_v63 }
 0x16a   : > { %v1222_v59 = vpop.f32.mrf.mxu1 }
 0x16b   : > { %v1220_v11 = vadd.f32 %v1219_v51, %v1171_v30 }
 0x16d   : > { %v2699_v12 = vadd.f32 %v1268_v0, %v1220_v11 }
 0x16e   : > { %v1124_v20 = vpop.f32.mrf.mxu3 }
 0x16f   : > { %1293 = vst.msk [vmem:[%s2608_s24 + $0x58] sm:$0xff] %vm1281_vm1, %v2699_v12  ;;  %v1319_v6 = vsel %vm1281_vm1, %v2699_v12, 0.0  ;;  %v1125_v14 = vadd.f32 %v1124_v20, %v2583_v15 }
 0x170   : > { %v1271_v23 = vpop.f32.mrf.mxu2  ;;  %v1320_v24 = vadd.f32 %v1319_v6, %v1318_v17  ;;  %v1175_v7 = vpop.f32.mrf.mxu0 }
 0x171   : > { %v1174_v27 = vadd.f32 %v1173_v8, %v1125_v14  ;;  %v1338_v8 = vmul.f32 %v2145_v55, %v1337_v53 }
 0x172   : > { %v1224_v13 = vpop.f32.mrf.mxu1 }
 0x173   : > { %v1223_v4 = vadd.f32 %v1222_v59, %v1174_v27 }
 0x175   : > { %v1272_v10 = vadd.f32 %v1271_v23, %v1223_v4 }
 0x176   : > { %v1126_v50 = vpop.f32.mrf.mxu3 }
 0x177   : > { %1294 = vst.msk [vmem:[%s2608_s24 + $0x60] sm:$0xff] %vm1281_vm1, %v1272_v10  ;;  %v1321_v26 = vsel %vm1281_vm1, %v1272_v10, 0.0  ;;  %v1127_v28 = vadd.f32 %v1126_v50, %v2593_v35 }
 0x178   : > { %v1322_v29 = vadd.f32 %v1321_v26, %v1320_v24  ;;  %v1273_v31 = vpop.f32.mrf.mxu2  ;;  %v1178_v16 = vpop.f32.mrf.mxu0 }
 0x179   : > { %v1176_v32 = vadd.f32 %v1175_v7, %v1127_v28 }
 0x17a   : > { %v1227_v22 = vpop.f32.mrf.mxu1 }
 0x17b   : > { %v1225_v33 = vadd.f32 %v1224_v13, %v1176_v32 }
 0x17d   : > { %v1274_v15 = vadd.f32 %v1273_v31, %v1225_v33 }
 0x17e   : > { %v1129_v40 = vpop.f32.mrf.mxu3 }
 0x17f   : > { %1295 = vst.msk [vmem:[%s2608_s24 + $0x68] sm:$0xff] %vm1281_vm1, %v1274_v15  ;;  %v1323_v39 = vsel %vm1281_vm1, %v1274_v15, 0.0  ;;  %v1130_v58 = vadd.f32 %v1129_v40, %v2596_v43 }
 0x180   : > { %v1324_v45 = vadd.f32 %v1323_v39, %v1322_v29  ;;  %v1276_v42 = vpop.f32.mrf.mxu2  ;;  %v1180_v36 = vpop.f32.mrf.mxu0 }
 0x181   : > { %v1179_v41 = vadd.f32 %v1178_v16, %v1130_v58 }
 0x182   : > { %v1229_v46 = vpop.f32.mrf.mxu1 }
 0x183   : > { %v1228_v35 = vadd.f32 %v1227_v22, %v1179_v41 }
 0x185   : > { %v1277_v48 = vadd.f32 %v1276_v42, %v1228_v35 }
 0x186   : > { %v1131_v49 = vpop.f32.mrf.mxu3 }
 0x187   : > { %1296 = vst.msk [vmem:[%s2608_s24 + $0x70] sm:$0xff] %vm1281_vm1, %v1277_v48  ;;  %v1325_v51 = vsel %vm1281_vm1, %v1277_v48, 0.0  ;;  %v1132_v54 = vadd.f32 %v1131_v49, %v2598_v52  ;;  %v1339_v52 = vadd.f32 %v2145_v55, %v1338_v8 }
 0x188   : > { %v1326_v56 = vadd.f32 %v1325_v51, %v1324_v45  ;;  %v1278_v63 = vpop.f32.mrf.mxu2 }
 0x189   : > { %v1181_v43 = vadd.f32 %v1180_v36, %v1132_v54  ;;  %v1341_v17 = vsel %vm1340_vm2, %v2145_v55, %v1339_v52 }
 0x18b   : > { %v1230_v61 = vadd.f32 %v1229_v46, %v1181_v43 }
 0x18d   : > { %v1279_v0 = vadd.f32 %v1278_v63, %v1230_v61 }
 0x18f   : > { %1297 = vst.msk [vmem:[%s2608_s24 + $0x78] sm:$0xff] %vm1281_vm1, %v1279_v0  ;;  %v1327_v3 = vsel %vm1281_vm1, %v1279_v0, 0.0 }
 0x190   : > { %v1328_v30 = vadd.f32 %v1327_v3, %v1326_v56 }
 0x192   : > { %v1329_v2 = vrot.slane %v1328_v30, 4 }
 0x194   : > { %v1330_v9 = vadd.f32 %v1329_v2, %v1328_v30 }
 0x196   : > { %v1331_v11 = vrot.slane %v1330_v9, 2 }
 0x198   : > { %v1332_v19 = vadd.f32 %v1331_v11, %v1330_v9 }
 0x19a   : > { %v1333_v59 = vrot.slane %v1332_v19, 1 }
 0x19c   : > { %v1334_v20 = vadd.f32 %v1333_v59, %v1332_v19 }
 0x19e   : > { %v2722_v6 = vmul.f32 %v1341_v17, %v1334_v20 }
 0x1a0   : > { %v1343_v14 = vsub.f32 %v2610_v1, %v2722_v6  ;;  %v1344_v23 = vsub.f32 %v2617_v21, %v2722_v6  ;;  %v1345_v24 = vsub.f32 %v2624_v38, %v2722_v6  ;;  %v1353_v27 = vsub.f32 %v2687_v60, %v2722_v6 }
 0x1a1   : > { %v1354_v4 = vsub.f32 %v2699_v12, %v2722_v6  ;;  %v1355_v7 = vsub.f32 %v1272_v10, %v2722_v6  ;;  %v1356_v13 = vsub.f32 %v1274_v15, %v2722_v6  ;;  %v1357_v50 = vsub.f32 %v1277_v48, %v2722_v6 }
 0x1a2   : > { %v1358_v1 = vsub.f32 %v1279_v0, %v2722_v6  ;;  %v1346_v21 = vsub.f32 %v2629_v37, %v2722_v6  ;;  %v1359_v26 = vmul.f32 %v1343_v14, %v1343_v14  ;;  %v1360_v28 = vmul.f32 %v1344_v23, %v1344_v23 }
 0x1a3   : > { %v1347_v38 = vsub.f32 %v2635_v47, %v2722_v6  ;;  %v1361_v60 = vmul.f32 %v1345_v24, %v1345_v24  ;;  %v1348_v12 = vsub.f32 %v2641_v57, %v2722_v6  ;;  %v1349_v33 = vsub.f32 %v2647_v5, %v2722_v6 }
 0x1a4   : > { %v1362_v29 = vmul.f32 %v1346_v21, %v1346_v21  ;;  %v1375_v10 = vsel %vm1281_vm1, %v1359_v26, 0.0  ;;  %v1376_v31 = vsel %vm1281_vm1, %v1360_v28, 0.0  ;;  %v1350_v47 = vsub.f32 %v2653_v25, %v2722_v6 }
 0x1a5   : > { %v1377_v32 = vadd.f32 %v1376_v31, %v1375_v10  ;;  %v1363_v15 = vmul.f32 %v1347_v38, %v1347_v38  ;;  %v1378_v37 = vsel %vm1281_vm1, %v1361_v60, 0.0  ;;  %v1364_v40 = vmul.f32 %v1348_v12, %v1348_v12 }
 0x1a6   : > { %v1380_v39 = vsel %vm1281_vm1, %v1362_v29, 0.0  ;;  %v1351_v58 = vsub.f32 %v2659_v18, %v2722_v6  ;;  %v1365_v45 = vmul.f32 %v1349_v33, %v1349_v33  ;;  %v1352_v5 = vsub.f32 %v2673_v34, %v2722_v6 }
 0x1a7   : > { %v1379_v16 = vadd.f32 %v1378_v37, %v1377_v32  ;;  %v1382_v22 = vsel %vm1281_vm1, %v1363_v15, 0.0  ;;  %v1366_v42 = vmul.f32 %v1350_v47, %v1350_v47  ;;  %v1384_v44 = vsel %vm1281_vm1, %v1364_v40, 0.0 }
 0x1a8   : > { %v1367_v48 = vmul.f32 %v1351_v58, %v1351_v58  ;;  %v1386_v25 = vsel %vm1281_vm1, %v1365_v45, 0.0  ;;  %v1368_v51 = vmul.f32 %v1352_v5, %v1352_v5  ;;  %v1369_v18 = vmul.f32 %v1353_v27, %v1353_v27 }
 0x1a9   : > { %v1381_v57 = vadd.f32 %v1380_v39, %v1379_v16  ;;  %v1388_v54 = vsel %vm1281_vm1, %v1366_v42, 0.0  ;;  %v1370_v43 = vmul.f32 %v1354_v4, %v1354_v4  ;;  %v1371_v61 = vmul.f32 %v1355_v7, %v1355_v7 }
 0x1aa   : > { %v1390_v56 = vsel %vm1281_vm1, %v1367_v48, 0.0  ;;  %v1392_v46 = vsel %vm1281_vm1, %v1368_v51, 0.0  ;;  %v1394_v62 = vsel %vm1281_vm1, %v1369_v18, 0.0  ;;  %v1372_v0 = vmul.f32 %v1356_v13, %v1356_v13 }
 0x1ab   : > { %v1383_v41 = vadd.f32 %v1382_v22, %v1381_v57  ;;  %v1396_v3 = vsel %vm1281_vm1, %v1370_v43, 0.0  ;;  %v1373_v30 = vmul.f32 %v1357_v50, %v1357_v50  ;;  %v1398_v2 = vsel %vm1281_vm1, %v1371_v61, 0.0 }
 0x1ac   : > { %v1374_v9 = vmul.f32 %v1358_v1, %v1358_v1  ;;  %v1400_v11 = vsel %vm1281_vm1, %v1372_v0, 0.0 }
 0x1ad   : > { %v1385_v35 = vadd.f32 %v1384_v44, %v1383_v41  ;;  %v1402_v19 = vsel %vm1281_vm1, %v1373_v30, 0.0 }
 0x1ae   : > { %v1404_v17 = vsel %vm1281_vm1, %v1374_v9, 0.0 }
 0x1af   : > { %v1387_v49 = vadd.f32 %v1386_v25, %v1385_v35 }
 0x1b1   : > { %v1389_v55 = vadd.f32 %v1388_v54, %v1387_v49 }
 0x1b3   : > { %v1391_v36 = vadd.f32 %v1390_v56, %v1389_v55 }
 0x1b5   : > { %v1393_v34 = vadd.f32 %v1392_v46, %v1391_v36 }
 0x1b7   : > { %v1395_v63 = vadd.f32 %v1394_v62, %v1393_v34 }
 0x1b9   : > { %v1397_v53 = vadd.f32 %v1396_v3, %v1395_v63 }
 0x1bb   : > { %v1399_v8 = vadd.f32 %v1398_v2, %v1397_v53 }
 0x1bd   : > { %v1401_v52 = vadd.f32 %v1400_v11, %v1399_v8 }
 0x1bf   : > { %v1403_v59 = vadd.f32 %v1402_v19, %v1401_v52 }
 0x1c1   : > { %v1405_v20 = vadd.f32 %v1404_v17, %v1403_v59 }
 0x1c3   : > { %v1406_v14 = vrot.slane %v1405_v20, 4 }
 0x1c5   : > { %v1407_v23 = vadd.f32 %v1406_v14, %v1405_v20 }
 0x1c7   : > { %v1408_v24 = vrot.slane %v1407_v23, 2 }
 0x1c9   : > { %v1409_v27 = vadd.f32 %v1408_v24, %v1407_v23  ;;  %1415 = sbr.rel (%p1988_p4) target bundleno = 465 (0x1d1), region = 32 }
 0x1cb   : > { %v1410_v4 = vrot.slane %v1409_v27, 1 }
 0x1cd   : > { %v1411_v7 = vadd.f32 %v1410_v4, %v1409_v27 }
 0x1ce   : > { %vm1416_vm3 = vcmask 253952  }
 0x1cf   : > { %1417 = vst.msk [vmem:[#allocation2] sm:$0x1] %vm1416_vm3, %v2722_v6 }
 0x1d0   : > { %1418 = vst.msk [vmem:[#allocation3] sm:$0x1] %vm1416_vm3, %v1411_v7 }
 0x1d1 PF: > { %p1989_p5 = scmp.le.s32.totalorder %s2216_s13, 0 }
 0x1d2   : > { %s1990_s5 = sshll.u32 (!%p1989_p5), %s2216_s13, 7 }
 0x1d3   : > { %1422 = sbr.rel (%p1989_p5) target bundleno = 549 (0x225), region = 36  ;;  %s1424_s25 = scvt.s32.f32 (!%p1989_p5), %s1990_s5 }
 0x1d5   : > { %s1425_s26 = sadd.f32 (!%p1989_p5), 128.0, %s1424_s25  ;;  %s1453_s27 = smul.f32 (!%p1989_p5), 128.0, %s1424_s25 }
 0x1d8   : > { %v1426_v13 = vstv %s1425_s26  ;;  %v1442_v31 = vld [vmem:[#allocation2] sm:$0x1]  ;;  %v1450_v33 = vld [vmem:[#allocation3] sm:$0x1]  ;;  %vm1448_vm8 = vcmask 253952  }
 0x1d9   : > { %2146 = vrcp.f32 %v1426_v13  ;;  %v1438_v21 = vand.u32 2147483648, %v1426_v13  ;;  %vm1432_vm4 = vweird.f32 %v1426_v13  ;;  %v1436_v28 = vand.u32 2147483647, %v1426_v13 }
 0x1da   : > { %v1443_v32 = vsub.f32 %v2722_v6, %v1442_v31  ;;  %v1451_v16 = vadd.f32 %v1450_v33, %v1411_v7 }
 0x1db   : > { %v1439_v60 = vor.u32 1.1754944e-38, %v1438_v21  ;;  %vm1437_vm7 = vcmp.eq.f32.partialorder %v1436_v28, 8.507059e+37 }
 0x1dc   : > { %v1452_v15 = vmul.f32 %v1443_v32, %v1443_v32 }
 0x1df   : > { %v2147_v50 = vpop.eup %2146 }
 0x1e0   : > { %v1428_v1 = vmul.f32 %v2147_v50, %v1426_v13  ;;  %vm1433_vm5 = vweird.f32 %v2147_v50 }
 0x1e1   : > { %vm1434_vm6 = vmor %vm1432_vm4, %vm1433_vm5 }
 0x1e2   : > { %v1429_v26 = vsub.f32 1.0, %v1428_v1 }
 0x1e4   : > { %v1430_v38 = vmul.f32 %v2147_v50, %v1429_v26 }
 0x1e6   : > { %v1431_v12 = vadd.f32 %v2147_v50, %v1430_v38 }
 0x1e8   : > { %v1435_v29 = vsel %vm1434_vm6, %v2147_v50, %v1431_v12 }
 0x1e9   : > { %v1440_v10 = vsel %vm1437_vm7, %v1439_v60, %v1435_v29 }
 0x1ea   : > { %2126 = vpush %v1440_v10 }
 0x21b   : > { %s2127_s28 = spop %2126 }
 0x21c   : > { %s1444_s29 = smul.f32 128.0, %s2127_s28 }
 0x21d   : > { %s1454_s30 = smul.f32 %s2127_s28, %s1453_s27 }
 0x21e   : > { %v1445_v37 = vstv %s1444_s29 }
 0x21f   : > { %v1446_v47 = vmul.f32 %v1445_v37, %v1443_v32  ;;  %v1455_v40 = vstv %s1454_s30 }
 0x220   : > { %v1456_v39 = vmul.f32 %v1455_v40, %v1452_v15 }
 0x221   : > { %v1447_v57 = vadd.f32 %v1446_v47, %v1442_v31 }
 0x222   : > { %v1457_v58 = vadd.f32 %v1456_v39, %v1451_v16 }
 0x223   : > { %1449 = vst.msk [vmem:[#allocation2] sm:$0x1] %vm1448_vm8, %v1447_v57 }
 0x224   : > { %1458 = vst.msk [vmem:[#allocation3] sm:$0x1] %vm1448_vm8, %v1457_v58 }
 0x225 PF: > { %p1991_p6 = scmp.ne.s32.totalorder %s2216_s13, 3 }
 0x227   : > { %1462 = sbr.rel (%p1991_p6) target bundleno = 560 (0x230), region = 40 }
 0x22c   : > { %v1463_v6 = vld [vmem:[#allocation2] sm:$0x1]  ;;  %vm1464_vm9 = vcmask 253952   ;;  %v1466_v45 = vld [vmem:[#allocation3] sm:$0x1] }
 0x22d   : > { %1465 = vst.msk [vmem:[#allocation4] sm:$0x1] %vm1464_vm9, %v1463_v6  ;;  %v1467_v22 = vmul.f32 0.001953125, %v1466_v45 }
 0x22f   : > { %1468 = vst.msk [vmem:[#allocation4 + $0x1] sm:$0x1] %vm1464_vm9, %v1467_v22 }
 0x230 PF: > { %p2132_p7 = scmp.eq.s32.totalorder %s2216_s13, 3  ;;  %s2189_s6 = smov [#allocation4]  }
 0x231   : > { %s1484_s7 = sshll.u32 %s2189_s6, 4  ;;  %s1486_s10 = sshll.u32 %s2784_s3, 4  ;;  %s1485_s7 = int_to_ptr.vmem [resolvable:$true] %s1484_s7  ;;  %s1487_s10 = int_to_ptr.hbm [resolvable:$true] %s1486_s10 }
 0x232   : > { %2129 = dma.vmem_to_hbm [thread:$0]  (%p2132_p7), %s1485_s7, 32, %s1487_s10, [#allocation5]  }
 0x233   : > { %2181 = dma.done.wait (%p2132_p7), [#allocation5], 32  }
 0x234   : > { %2183 = vsyncadd (%p2132_p7), [#allocation5], 4294967264 }
 0x235 PF: > { %s15_s12 = sadd.s32 1, %s2186_s12  }
 0x236   : > { %p12_p8 = scmp.ge.s32.totalorder %s15_s12, 6  }
 0x238   :  { %14 = sbr.rel (!%p12_p8) target bundleno = 1 (0x1), region = 79 }
 0x23d   :  { %1508 = vsyncpa [#allocation5], 1 }
 0x23e   :  { %1510 = vsyncpa [#allocation5 + $0x1], 1 }

</bundles_post_ra>
